<compile_context>
chip_gen: v5e
topology: v5e:2x2
jax: 0.10.0
libtpu: 0.0.40
codegen_flags: <defaults>
</compile_context>

<pallas_src>
import functools

import jax
import jax.numpy as jnp
from jax.experimental import pallas as pl
from jax.experimental.pallas import tpu as pltpu

_LANE = 128      # lane width  (last dim alignment)
_SUBLANE = 8     # sublane     (second-to-last dim alignment)


def _round_up(x, m):
    return (x + m - 1) // m * m


def _fused_mlp_kernel(x_ref, *refs, n_layers, apply_sigmoid):
    """refs = (w0, b0, w1, b1, ..., w_{L-1}, b_{L-1}, o_ref). All tiles in VMEM."""
    o_ref = refs[-1]
    wb = refs[:-1]
    h = x_ref[...]
    for i in range(n_layers):
        w = wb[2 * i][...]          # [Din_pad, Dout_pad]
        b = wb[2 * i + 1][...]      # [1, Dout_pad] -> broadcasts over batch rows
        h = jnp.dot(h, w, preferred_element_type=jnp.float32) + b
        if i != n_layers - 1:
            h = jnp.maximum(h, 0.0)                 # ReLU (VPU)
        elif apply_sigmoid:
            h = jax.nn.sigmoid(h)                   # EUP; padded cols sliced off outside
    o_ref[...] = h.astype(o_ref.dtype)


def _pad_params(params):
    """Zero-pad weights/biases so every feature dim is a multiple of 128."""
    padded = []
    for w, b in params:
        d_in, d_out = w.shape
        dip, dop = _round_up(d_in, _LANE), _round_up(d_out, _LANE)
        wp = jnp.zeros((dip, dop), w.dtype).at[:d_in, :d_out].set(w)
        bp = jnp.zeros((1, dop), b.dtype).at[0, :d_out].set(b)
        padded.append((wp, bp))
    return padded


def mlp_forward(x, params, *, discrim=False, dropout=-1, block_b=512):
    """Forward pass matching MLP.forward. x: [B, input_dim]; params: [(W[Din,Dout], b[Dout])]."""
    # TODO(synk): dropout != -1 not implemented (module default is -1 / inference);
    # would use pltpu.prng_seed + pltpu.stateful_bernoulli in-kernel.
    del dropout

    B, d_in = x.shape
    d_out = params[-1][0].shape[1]
    n_layers = len(params)

    padded = _pad_params(params)
    d_in_pad = padded[0][0].shape[0]
    d_out_pad = padded[-1][0].shape[1]

    # Batch tile: multiple of 8 sublanes; weights stay resident across tiles.
    block_b = min(block_b, _round_up(B, _SUBLANE))
    b_pad = _round_up(B, block_b)
    xp = jnp.zeros((b_pad, d_in_pad), x.dtype).at[:B, :d_in].set(x)

    in_specs = [pl.BlockSpec((block_b, d_in_pad), lambda i: (i, 0))]
    flat_inputs = [xp]
    for wp, bp in padded:
        in_specs.append(pl.BlockSpec(wp.shape, lambda i: (0, 0)))   # resident weight
        in_specs.append(pl.BlockSpec(bp.shape, lambda i: (0, 0)))   # resident bias
        flat_inputs += [wp, bp]

    kernel = functools.partial(
        _fused_mlp_kernel, n_layers=n_layers, apply_sigmoid=discrim
    )

    out = pl.pallas_call(
        kernel,
        out_shape=jax.ShapeDtypeStruct((b_pad, d_out_pad), x.dtype),
        grid_spec=pl.GridSpec(
            grid=(b_pad // block_b,),
            in_specs=in_specs,
            out_specs=pl.BlockSpec((block_b, d_out_pad), lambda i: (i, 0)),
        ),
        compiler_params=pltpu.CompilerParams(
            dimension_semantics=("parallel",),   # batch tiles shard across TCs
        ),
    )(*flat_inputs)

    # Slice padded batch rows / padded output lanes back off (keeps parity with
    # the reference even when sigmoid produced 0.5 in padded columns).
    return out[:B, :d_out]


def init_mlp_params(key, input_dim, output_dim, hidden_size=(64, 32)):
    """Deterministic parameter init (PyTorch nn.Linear-style uniform bounds).
    Weights stored pre-transposed as [d_in, d_out] so the kernel computes x @ W + b."""
    dims = [input_dim, *hidden_size, output_dim]
    params = []
    for i in range(len(dims) - 1):
        d_in, d_out = dims[i], dims[i + 1]
        key, kw, kb = jax.random.split(key, 3)
        bound = 1.0 / (d_in ** 0.5)
        w = jax.random.uniform(kw, (d_in, d_out), jnp.float32, -bound, bound)
        b = jax.random.uniform(kb, (d_out,), jnp.float32, -bound, bound)
        params.append((w, b))
    return params


def mlp_reference(x, params, *, discrim=False):
    """Plain-JAX reference for correctness check."""
    n = len(params)
    for i, (w, b) in enumerate(params):
        x = x @ w + b
        if i != n - 1:
            x = jnp.maximum(x, 0.0)
        elif discrim:
            x = jax.nn.sigmoid(x)
    return x


if __name__ == "__main__":
    key = jax.random.PRNGKey(0)
    kx1, kx2, kp1, kp2 = jax.random.split(key, 4)

    # Config 1: HRT.node2edge_mlp — MLP(node_dim -> node_dim, hidden=(node_hidden_dim,))
    node_dim, node_hidden_dim = 64, 128
    batch_rows = 16                     # e.g. 2 samples x 8 nodes, flattened

    x1 = jax.random.normal(kx1, (batch_rows, node_dim), jnp.float32)
    params1 = init_mlp_params(kp1, node_dim, node_dim, (node_hidden_dim,))
    out1 = jax.block_until_ready(mlp_forward(x1, params1, discrim=False, dropout=-1))
    ref1 = mlp_reference(x1, params1, discrim=False)
    assert out1.shape == (batch_rows, node_dim)
    assert jnp.allclose(out1, ref1, atol=1e-4, rtol=1e-4), "mismatch vs reference (cfg1)"

    # Config 2: HRT.attention_mlp-style — MLP(node_dim+edge_dim -> 1, hidden=(32,)),
    # with discrim=True to exercise the sigmoid path and heavy lane padding (1 -> 128).
    in_dim2, out_dim2 = node_dim + node_dim, 1
    x2 = jax.random.normal(kx2, (batch_rows, in_dim2), jnp.float32)
    params2 = init_mlp_params(kp2, in_dim2, out_dim2, (32,))
    out2 = jax.block_until_ready(mlp_forward(x2, params2, discrim=True, dropout=-1))
    ref2 = mlp_reference(x2, params2, discrim=True)
    assert out2.shape == (batch_rows, out_dim2)
    assert jnp.allclose(out2, ref2, atol=1e-4, rtol=1e-4), "mismatch vs reference (cfg2)"

    print("KERNEL_OK")
</pallas_src>

<mosaic_0001>
module attributes {stable_mosaic.version = 11 : i64} {
  func.func @_fused_mlp_kernel(%arg0: i32, %arg1: memref<16x128xf32, #tpu.memory_space<vmem>>, %arg2: memref<128x128xf32, #tpu.memory_space<vmem>>, %arg3: memref<1x128xf32, #tpu.memory_space<vmem>>, %arg4: memref<128x128xf32, #tpu.memory_space<vmem>>, %arg5: memref<1x128xf32, #tpu.memory_space<vmem>>, %arg6: memref<16x128xf32, #tpu.memory_space<vmem>>) attributes {dimension_semantics = [#tpu.dimension_semantics<parallel>], iteration_bounds = array<i64: 1>, scalar_prefetch = 0 : i64, scratch_operands = 0 : i64, tpu.core_type = #tpu.core_type<tc>, window_params = [{transform_indices = @transform_0, window_bounds = array<i64: 16, 128>}, {pipeline_mode = #tpu.pipeline_mode<synchronous>, transform_indices = @transform_1, window_bounds = array<i64: 128, 128>}, {pipeline_mode = #tpu.pipeline_mode<synchronous>, transform_indices = @transform_2, window_bounds = array<i64: 1, 128>}, {pipeline_mode = #tpu.pipeline_mode<synchronous>, transform_indices = @transform_3, window_bounds = array<i64: 128, 128>}, {pipeline_mode = #tpu.pipeline_mode<synchronous>, transform_indices = @transform_4, window_bounds = array<i64: 1, 128>}, {transform_indices = @transform_5, window_bounds = array<i64: 16, 128>}]} {
    %c0 = arith.constant 0 : index
    %c0_0 = arith.constant 0 : index
    %0 = vector.load %arg1[%c0, %c0_0] : memref<16x128xf32, #tpu.memory_space<vmem>>, vector<16x128xf32>
    %c0_1 = arith.constant 0 : index
    %c0_2 = arith.constant 0 : index
    %1 = vector.load %arg2[%c0_1, %c0_2] : memref<128x128xf32, #tpu.memory_space<vmem>>, vector<128x128xf32>
    %c0_3 = arith.constant 0 : index
    %c0_4 = arith.constant 0 : index
    %2 = vector.load %arg3[%c0_3, %c0_4] : memref<1x128xf32, #tpu.memory_space<vmem>>, vector<1x128xf32>
    %cst = arith.constant dense<0.000000e+00> : vector<16x128xf32>
    %3 = tpu.matmul %0, %1, %cst {dimension_numbers = #tpu.dot_dimension_numbers<[1], [0], [0], [1], [0, 0, 1, 1], [], []>} : vector<16x128xf32>, vector<128x128xf32>, vector<16x128xf32> -> vector<16x128xf32>
    %4 = vector.broadcast %2 : vector<1x128xf32> to vector<16x128xf32>
    %5 = arith.addf %3, %4 : vector<16x128xf32>
    %cst_5 = arith.constant 0.000000e+00 : f32
    %6 = vector.broadcast %cst_5 : f32 to vector<16x128xf32>
    %7 = arith.maximumf %5, %6 : vector<16x128xf32>
    %c0_6 = arith.constant 0 : index
    %c0_7 = arith.constant 0 : index
    %8 = vector.load %arg4[%c0_6, %c0_7] : memref<128x128xf32, #tpu.memory_space<vmem>>, vector<128x128xf32>
    %c0_8 = arith.constant 0 : index
    %c0_9 = arith.constant 0 : index
    %9 = vector.load %arg5[%c0_8, %c0_9] : memref<1x128xf32, #tpu.memory_space<vmem>>, vector<1x128xf32>
    %cst_10 = arith.constant dense<0.000000e+00> : vector<16x128xf32>
    %10 = tpu.matmul %7, %8, %cst_10 {dimension_numbers = #tpu.dot_dimension_numbers<[1], [0], [0], [1], [0, 0, 1, 1], [], []>} : vector<16x128xf32>, vector<128x128xf32>, vector<16x128xf32> -> vector<16x128xf32>
    %11 = vector.broadcast %9 : vector<1x128xf32> to vector<16x128xf32>
    %12 = arith.addf %10, %11 : vector<16x128xf32>
    %c0_11 = arith.constant 0 : index
    %c0_12 = arith.constant 0 : index
    %13 = vector.load %arg6[%c0_11, %c0_12] : memref<16x128xf32, #tpu.memory_space<vmem>>, vector<16x128xf32>
    tpu.vector_store %arg6[%c0_11, %c0_12], %12 {strides = array<i32>} : memref<16x128xf32, #tpu.memory_space<vmem>>, vector<16x128xf32>,
    return
  }
  func.func @transform_0(%arg0: i32) -> (i32, i32) {
    %c0_i32 = arith.constant 0 : i32
    %c0_i32_0 = arith.constant 0 : i32
    return %arg0, %c0_i32 : i32, i32
  }
  func.func @transform_1(%arg0: i32) -> (i32, i32) {
    %c0_i32 = arith.constant 0 : i32
    %c0_i32_0 = arith.constant 0 : i32
    %c0_i32_1 = arith.constant 0 : i32
    return %c0_i32, %c0_i32_0 : i32, i32
  }
  func.func @transform_2(%arg0: i32) -> (i32, i32) {
    %c0_i32 = arith.constant 0 : i32
    %c0_i32_0 = arith.constant 0 : i32
    %c0_i32_1 = arith.constant 0 : i32
    return %c0_i32, %c0_i32_0 : i32, i32
  }
  func.func @transform_3(%arg0: i32) -> (i32, i32) {
    %c0_i32 = arith.constant 0 : i32
    %c0_i32_0 = arith.constant 0 : i32
    %c0_i32_1 = arith.constant 0 : i32
    return %c0_i32, %c0_i32_0 : i32, i32
  }
  func.func @transform_4(%arg0: i32) -> (i32, i32) {
    %c0_i32 = arith.constant 0 : i32
    %c0_i32_0 = arith.constant 0 : i32
    %c0_i32_1 = arith.constant 0 : i32
    return %c0_i32, %c0_i32_0 : i32, i32
  }
  func.func @transform_5(%arg0: i32) -> (i32, i32) {
    %c0_i32 = arith.constant 0 : i32
    %c0_i32_0 = arith.constant 0 : i32
    return %arg0, %c0_i32 : i32, i32
  }
}

</mosaic_0001>

<bundles_post_ra>
// kernel: tpu_custom_call.1
= control target key start
LH: loop header
LB: loop body
LE: loop exit
PB: predicated region body
PF: predicated region fallthrough
CT: control target
= control target key end

     0   :  { %10 = vsyncpa [#allocation3], 0  ;;  %s388_s0 = inlined_call_operand.hbm [shape: f32[16,128], index: 0, kind: input, shape index: {}]   ;;  %s389_s1 = inlined_call_operand.hbm [shape: f32[128,128], index: 1, kind: input, shape index: {}]   ;;  %s390_s2 = inlined_call_operand.vmem [shape: f32[1,128], index: 2, kind: input, shape index: {}]   ;;  %s391_s3 = inlined_call_operand.hbm [shape: f32[128,128], index: 3, kind: input, shape index: {}]   ;;  %s392_s4 = inlined_call_operand.vmem [shape: f32[1,128], index: 4, kind: input, shape index: {}]   ;;  %s393_s5 = inlined_call_operand.hbm [shape: f32[16,128], index: 5, kind: output, shape index: {}]  }
   0x1   :  { %11 = vsyncpa [#allocation6], 0 }
   0x2   :  { %12 = vsyncpa [#allocation4], 0  ;;  %s30_s20 = sshll.u32 %s389_s1, 4  ;;  %s322_s21 = smov [#allocation5]   ;;  %s31_s20 = int_to_ptr.hbm [resolvable:$true] %s30_s20 }
   0x3   :  { %s32_s22 = sshll.u32 %s322_s21, 4  ;;  %s17_s25 = sshll.u32 %s388_s0, 4  ;;  %s33_s22 = int_to_ptr.vmem [resolvable:$true] %s32_s22  ;;  %s18_s25 = int_to_ptr.hbm [resolvable:$true] %s17_s25 }
   0x4   :  { %s323_s26 = smov 128   ;;  %s324_s27 = smov 8  }
   0x5   :  { %38 = dma.hbm_to_vmem [thread:$0]  %s31_s20, 2048, %s33_s22, [#allocation6], %s323_s26, %s323_s26, %s324_s27  }
   0x6   :  { %s325_s28 = smov [#allocation2]   ;;  %s45_s1 = sshll.u32 %s391_s3, 4  ;;  %s46_s1 = int_to_ptr.hbm [resolvable:$true] %s45_s1 }
   0x7   :  { %s19_s29 = sshll.u32 %s325_s28, 4  ;;  %s326_s0 = smov [#allocation7]   ;;  %s20_s29 = int_to_ptr.vmem [resolvable:$true] %s19_s29 }
   0x8   :  { %25 = dma.hbm_to_vmem [thread:$0]  %s18_s25, 256, %s20_s29, [#allocation3], %s323_s26, %s323_s26, %s324_s27  }
   0x9   :  { %s47_s7 = sshll.u32 %s326_s0, 4  ;;  %s48_s7 = int_to_ptr.vmem [resolvable:$true] %s47_s7 }
   0xa   :  { %53 = dma.hbm_to_vmem [thread:$0]  %s46_s1, 2048, %s48_s7, [#allocation6], %s323_s26, %s323_s26, %s324_s27  }
   0xb   :  { %316 = dma.done.wait [#allocation3], 256  }
   0xc   :  { %317 = vsyncadd [#allocation3], 4294967040 }
   0xd   :  { %318 = dma.done.wait [#allocation6], 4096  }
   0xe   :  { %319 = vsyncadd [#allocation6], 4294963200  ;;  %v85_v0 = vld [vmem:[#allocation5 + $0x78] sm:$0xff]  ;;  %v84_v1 = vld [vmem:[#allocation5 + $0x70] sm:$0xff]  ;;  %s327_s11 = smov [#allocation8]  }
   0xf   :  { %180 = vmatpush.msra.mxu2 %v85_v0  ;;  %90 = vmatpush.msra.mxu0 %v85_v0  ;;  %v83_v2 = vld [vmem:[#allocation5 + $0x68] sm:$0xff]  ;;  %v82_v3 = vld [vmem:[#allocation5 + $0x60] sm:$0xff]  ;;  %v81_v4 = vld [vmem:[#allocation5 + $0x58] sm:$0xff]  ;;  %s164_s12 = sshll.u32 %s327_s11, 4  ;;  %s165_s12 = int_to_ptr.vmem [resolvable:$true] %s164_s12 }
  0x10   :  { %v130_v5 = vld [vmem:[#allocation7 + $0x78] sm:$0xff]  ;;  %v129_v6 = vld [vmem:[#allocation7 + $0x70] sm:$0xff]  ;;  %v128_v8 = vld [vmem:[#allocation7 + $0x68] sm:$0xff] }
  0x11   :  { %181 = vmatpush.msra.mxu2 %v84_v1  ;;  %91 = vmatpush.msra.mxu0 %v84_v1  ;;  %v80_v7 = vld [vmem:[#allocation5 + $0x50] sm:$0xff]  ;;  %v79_v9 = vld [vmem:[#allocation5 + $0x48] sm:$0xff]  ;;  %v127_v10 = vld [vmem:[#allocation7 + $0x60] sm:$0xff] }
  0x12   :  { %196 = vmatpush.msra.mxu3 %v130_v5  ;;  %135 = vmatpush.msra.mxu1 %v130_v5  ;;  %v78_v11 = vld [vmem:[#allocation5 + $0x40] sm:$0xff]  ;;  %v126_v12 = vld [vmem:[#allocation7 + $0x58] sm:$0xff]  ;;  %v125_v14 = vld [vmem:[#allocation7 + $0x50] sm:$0xff] }
  0x13   :  { %182 = vmatpush.msra.mxu2 %v83_v2  ;;  %92 = vmatpush.msra.mxu0 %v83_v2  ;;  %v77_v13 = vld [vmem:[#allocation5 + $0x38] sm:$0xff]  ;;  %v76_v15 = vld [vmem:[#allocation5 + $0x30] sm:$0xff]  ;;  %v124_v16 = vld [vmem:[#allocation7 + $0x48] sm:$0xff] }
  0x14   :  { %197 = vmatpush.msra.mxu3 %v129_v6  ;;  %136 = vmatpush.msra.mxu1 %v129_v6  ;;  %v75_v17 = vld [vmem:[#allocation5 + $0x28] sm:$0xff]  ;;  %v123_v18 = vld [vmem:[#allocation7 + $0x40] sm:$0xff]  ;;  %v122_v20 = vld [vmem:[#allocation7 + $0x38] sm:$0xff] }
  0x15   :  { %183 = vmatpush.msra.mxu2 %v82_v3  ;;  %93 = vmatpush.msra.mxu0 %v82_v3  ;;  %v74_v19 = vld [vmem:[#allocation5 + $0x20] sm:$0xff]  ;;  %v73_v21 = vld [vmem:[#allocation5 + $0x18] sm:$0xff]  ;;  %v121_v22 = vld [vmem:[#allocation7 + $0x30] sm:$0xff] }
  0x16   :  { %198 = vmatpush.msra.mxu3 %v128_v8  ;;  %137 = vmatpush.msra.mxu1 %v128_v8  ;;  %v72_v23 = vld [vmem:[#allocation5 + $0x10] sm:$0xff]  ;;  %v120_v24 = vld [vmem:[#allocation7 + $0x28] sm:$0xff]  ;;  %v119_v26 = vld [vmem:[#allocation7 + $0x20] sm:$0xff] }
  0x17   :  { %184 = vmatpush.msra.mxu2 %v81_v4  ;;  %94 = vmatpush.msra.mxu0 %v81_v4  ;;  %v71_v25 = vld [vmem:[#allocation5 + $0x8] sm:$0xff]  ;;  %v70_v27 = vld [vmem:[#allocation5] sm:$0xff]  ;;  %v69_v28 = vld [vmem:[#allocation2 + $0x8] sm:$0xff] }
  0x18   :  { %199 = vmatpush.msra.mxu3 %v127_v10  ;;  %138 = vmatpush.msra.mxu1 %v127_v10  ;;  %v68_v29 = vld [vmem:[#allocation2] sm:$0xff]  ;;  %v118_v30 = vld [vmem:[#allocation7 + $0x18] sm:$0xff]  ;;  %v116_v32 = vld [vmem:[#allocation7 + $0x8] sm:$0xff] }
  0x19   :  { %185 = vmatpush.msra.mxu2 %v80_v7  ;;  %95 = vmatpush.msra.mxu0 %v80_v7  ;;  %v117_v31 = vld [vmem:[#allocation7 + $0x10] sm:$0xff]  ;;  %v115_v33 = vld [vmem:[#allocation7] sm:$0xff] }
  0x1a   :  { %200 = vmatpush.msra.mxu3 %v126_v12  ;;  %139 = vmatpush.msra.mxu1 %v126_v12  ;;  %v218_v34 = vld [vmem:[%s390_s2] ss:$0 sm:$0xff]  ;;  %s166_s2 = sshll.u32 %s393_s5, 4  ;;  %s167_s2 = int_to_ptr.hbm [resolvable:$true] %s166_s2 }
  0x1b   :  { %186 = vmatpush.msra.mxu2 %v79_v9  ;;  %96 = vmatpush.msra.mxu0 %v79_v9  ;;  %v219_v41 = vld [vmem:[%s392_s4] ss:$0 sm:$0xff] }
  0x1c   :  { %201 = vmatpush.msra.mxu3 %v125_v14  ;;  %140 = vmatpush.msra.mxu1 %v125_v14 }
  0x1d   :  { %187 = vmatpush.msra.mxu2 %v78_v11  ;;  %97 = vmatpush.msra.mxu0 %v78_v11 }
  0x1e   :  { %202 = vmatpush.msra.mxu3 %v124_v16  ;;  %141 = vmatpush.msra.mxu1 %v124_v16 }
  0x1f   :  { %188 = vmatpush.msra.mxu2 %v77_v13  ;;  %98 = vmatpush.msra.mxu0 %v77_v13 }
  0x20   :  { %203 = vmatpush.msra.mxu3 %v123_v18  ;;  %142 = vmatpush.msra.mxu1 %v123_v18 }
  0x21   :  { %189 = vmatpush.msra.mxu2 %v76_v15  ;;  %99 = vmatpush.msra.mxu0 %v76_v15 }
  0x22   :  { %204 = vmatpush.msra.mxu3 %v122_v20  ;;  %143 = vmatpush.msra.mxu1 %v122_v20 }
  0x23   :  { %190 = vmatpush.msra.mxu2 %v75_v17  ;;  %100 = vmatpush.msra.mxu0 %v75_v17 }
  0x24   :  { %205 = vmatpush.msra.mxu3 %v121_v22  ;;  %144 = vmatpush.msra.mxu1 %v121_v22 }
  0x25   :  { %191 = vmatpush.msra.mxu2 %v74_v19  ;;  %101 = vmatpush.msra.mxu0 %v74_v19 }
  0x26   :  { %206 = vmatpush.msra.mxu3 %v120_v24  ;;  %145 = vmatpush.msra.mxu1 %v120_v24 }
  0x27   :  { %192 = vmatpush.msra.mxu2 %v73_v21  ;;  %102 = vmatpush.msra.mxu0 %v73_v21 }
  0x28   :  { %207 = vmatpush.msra.mxu3 %v119_v26  ;;  %146 = vmatpush.msra.mxu1 %v119_v26 }
  0x29   :  { %193 = vmatpush.msra.mxu2 %v72_v23  ;;  %103 = vmatpush.msra.mxu0 %v72_v23 }
  0x2a   :  { %208 = vmatpush.msra.mxu3 %v118_v30  ;;  %147 = vmatpush.msra.mxu1 %v118_v30 }
  0x2b   :  { %194 = vmatpush.msra.mxu2 %v71_v25  ;;  %104 = vmatpush.msra.mxu0 %v71_v25 }
  0x2c   :  { %209 = vmatpush.msra.mxu3 %v117_v31  ;;  %148 = vmatpush.msra.mxu1 %v117_v31 }
  0x2d   :  { %195 = vmatpush.msra.mxu2 %v70_v27  ;;  %105 = vmatpush.msra.mxu0 %v70_v27 }
  0x2e   :  { %109 = vmatmul.f32.vlgmr.msra.gmra.mxu2 %v69_v28  ;;  %106 = vmatmul.f32.vlgmr.msra.gmra.mxu0 %v68_v29 }
  0x2f   :  { %210 = vmatpush.msra.mxu3 %v116_v32  ;;  %149 = vmatpush.msra.mxu1 %v116_v32 }
  0x31   :  { %211 = vmatpush.msra.mxu3 %v115_v33  ;;  %150 = vmatpush.msra.mxu1 %v115_v33 }
  0xab   :  { %v107_v35 = vpop.f32.mrf.mxu0 }
  0xac   :  { %v108_v36 = vadd.f32 %v218_v34, %v107_v35 }
  0xae   :  { %v113_v37 = vmax.f32 %v108_v36, 0.0 }
  0xb0   :  { %151 = vmatmul.f32.vlgmr.msra.gmra.mxu1 %v113_v37 }
  0xb1   :  { %v110_v38 = vpop.f32.mrf.mxu2 }
  0xb2   :  { %v111_v39 = vadd.f32 %v218_v34, %v110_v38 }
  0xb4   :  { %v114_v40 = vmax.f32 %v111_v39, 0.0 }
  0xb6   :  { %154 = vmatmul.f32.vlgmr.msra.gmra.mxu3 %v114_v40 }
 0x12d   :  { %v152_v42 = vpop.f32.mrf.mxu1 }
 0x12e   :  { %v153_v43 = vadd.f32 %v219_v41, %v152_v42 }
 0x130   :  { %158 = vst [vmem:[#allocation8] sm:$0xff] %v153_v43 }
 0x139   :  { %v155_v44 = vpop.f32.mrf.mxu3 }
 0x13a   :  { %v156_v45 = vadd.f32 %v219_v41, %v155_v44 }
 0x13c   :  { %159 = vst [vmem:[#allocation8 + $0x8] sm:$0xff] %v156_v45 }
 0x13d   :  { %172 = dma.vmem_to_hbm [thread:$0]  %s165_s12, 256, %s167_s2, [#allocation4], %s323_s26, %s323_s26, %s324_s27  }
 0x13e   :  { %320 = dma.done.wait [#allocation4], 256  }
 0x13f   :  { %321 = vsyncadd [#allocation4], 4294967040 }
 0x140   :  { %177 = vsyncpa [#allocation3], 1 }
 0x141   :  { %178 = vsyncpa [#allocation6], 1 }
 0x142   :  { %179 = vsyncpa [#allocation4], 1 }

</bundles_post_ra>
